<compile_context>
chip_gen: v7x
topology: tpu7x:2x2x1
jax: 0.10.0
libtpu: 0.0.40
codegen_flags: <defaults>
</compile_context>

<pallas_src>
import math

import jax
import jax.numpy as jnp
from jax.experimental import pallas as pl
from jax.experimental.pallas import tpu as pltpu

_GELU_C = math.sqrt(2.0 / math.pi)


def _cdiv(a: int, b: int) -> int:
    return -(-a // b)


def _round_up(x: int, m: int) -> int:
    return _cdiv(x, m) * m


def _gelu_tanh(h):
    # GELU(x) = 0.5*x*(1 + tanh(sqrt(2/pi)*(x + 0.044715*x^3)))  (matches the
    # PyTorch GELU module in the spec). h is f32; tanh goes to the EUP slot.
    return 0.5 * h * (1.0 + jnp.tanh(jnp.float32(_GELU_C) * (h + 0.044715 * (h * h * h))))


# ---------------------------------------------------------------------------
# Kernels
# ---------------------------------------------------------------------------

def ffn_kernel_resident(x_ref, w1_ref, b1_ref, w2_ref, b2_ref, o_ref):
    """1-D grid over tokens; full W1/W2 resident in VMEM."""
    h = jnp.dot(x_ref[...], w1_ref[...], preferred_element_type=jnp.float32)
    h = h + b1_ref[...].astype(jnp.float32)
    g = _gelu_tanh(h)
    out = jnp.dot(g.astype(w2_ref.dtype), w2_ref[...],
                  preferred_element_type=jnp.float32)
    o_ref[...] = (out + b2_ref[...].astype(jnp.float32)).astype(o_ref.dtype)


def ffn_kernel_tiled_f32out(x_ref, w1_ref, b1_ref, w2_ref, b2_ref, o_ref):
    """2-D grid (tokens, hidden tiles); accumulate directly into f32 output."""
    j = pl.program_id(1)

    @pl.when(j == 0)
    def _():
        o_ref[...] = jnp.broadcast_to(b2_ref[...].astype(o_ref.dtype), o_ref.shape)

    h = jnp.dot(x_ref[...], w1_ref[...], preferred_element_type=jnp.float32)
    h = h + b1_ref[...].astype(jnp.float32)
    g = _gelu_tanh(h)
    o_ref[...] += jnp.dot(g.astype(w2_ref.dtype), w2_ref[...],
                          preferred_element_type=jnp.float32).astype(o_ref.dtype)


def ffn_kernel_tiled_acc(x_ref, w1_ref, b1_ref, w2_ref, b2_ref, o_ref, acc_ref):
    """2-D grid (tokens, hidden tiles); f32 scratch accumulator (non-f32 out)."""
    j = pl.program_id(1)

    @pl.when(j == 0)
    def _():
        acc_ref[...] = jnp.zeros_like(acc_ref)

    h = jnp.dot(x_ref[...], w1_ref[...], preferred_element_type=jnp.float32)
    h = h + b1_ref[...].astype(jnp.float32)
    g = _gelu_tanh(h)
    acc_ref[...] += jnp.dot(g.astype(w2_ref.dtype), w2_ref[...],
                            preferred_element_type=jnp.float32)

    @pl.when(j == pl.num_programs(1) - 1)
    def _():
        o_ref[...] = (acc_ref[...] + b2_ref[...].astype(jnp.float32)
                      ).astype(o_ref.dtype)


# ---------------------------------------------------------------------------
# Tile / VMEM budgeting
# ---------------------------------------------------------------------------

def _vmem_budget():
    """(physical VMEM per core, scoped-VMEM request leaving headroom)."""
    try:
        cap = int(pltpu.get_tpu_info().vmem_capacity_bytes)
    except Exception:
        cap = 128 * 1024 * 1024
    # Leave ~16 MiB for compiler-internal scratch / semaphores. This matters on
    # v7x (64 MiB physical per TensorCore): never request the full chip VMEM.
    limit = max(cap - 16 * 1024 * 1024, 32 * 1024 * 1024)
    return cap, limit


def _select_tiles(n_tok, E_pad, H, w_itemsize, x_itemsize,
                  vmem_cap, vmem_limit, out_acc_in_place):
    """Pick (tm, th, H_pad) roofline- and VMEM-aware."""
    H_base = _round_up(max(H, 128), 128)
    # Bigger tm amortizes W1/W2 streaming (arithmetic intensity ~ tm FLOP/byte).
    tm_target = 1024 if vmem_cap >= 128 * 1024 * 1024 else 512

    def fits(tm_, th_, resident):
        w = 2 * 2 * E_pad * th_ * w_itemsize          # W1 + W2 tiles, 2x buffered
        xo = 2 * tm_ * E_pad * 2 * x_itemsize         # x + out tiles, 2x buffered
        inter = 2 * tm_ * th_ * 4                     # h / g f32 intermediates
        acc = 0 if (resident or out_acc_in_place) else tm_ * E_pad * 4
        return w + xo + inter + acc <= vmem_limit

    while True:
        # Bound token over-padding: tm ~ n_tok / ceil(n_tok / tm_target).
        n_rows = max(1, _cdiv(n_tok, tm_target))
        tm = max(8, min(_round_up(_cdiv(n_tok, n_rows), 8), _round_up(tm_target, 8)))

        # 1) Full weights resident -> 1-D grid over tokens.
        if fits(tm, H_base, resident=True):
            return tm, H_base, H_base

        # 2) Tile the hidden dim; bound H over-padding (th near a divisor).
        for th_target in (512, 384, 256, 128):
            n_h = _cdiv(H_base, th_target)
            th = _round_up(_cdiv(H_base, n_h), 128)
            if fits(tm, th, resident=False):
                return tm, th, n_h * th

        if tm_target <= 64:
            # Minimal tiles; let the compiler cope.
            n_h = _cdiv(H_base, 128)
            return 64, 128, n_h * 128
        tm_target //= 2


def _pad2(a, rows, cols):
    pr, pc = rows - a.shape[0], cols - a.shape[1]
    if pr or pc:
        a = jnp.pad(a, ((0, pr), (0, pc)))
    return a


def _pad1(a, n):
    p = n - a.shape[0]
    if p:
        a = jnp.pad(a, (0, p))
    return a


# ---------------------------------------------------------------------------
# Wrapper
# ---------------------------------------------------------------------------

def feed_forward(x, w1, b1, w2, b2, *, tm=None, th=None,
                 vmem_limit_bytes=None, cast_weights_to_bf16=False):
    """x: [B, S, E]; w1: [E, 4E]; b1: [4E]; w2: [4E, E]; b2: [E]."""
    B, S, E = x.shape
    H = w1.shape[1]
    n_tok = B * S

    if cast_weights_to_bf16:
        # Halves weight HBM traffic / VMEM; accumulation stays f32 in-kernel.
        w1 = w1.astype(jnp.bfloat16)
        b1 = b1.astype(jnp.bfloat16)
        w2 = w2.astype(jnp.bfloat16)
        b2 = b2.astype(jnp.bfloat16)

    w_itemsize = jnp.dtype(w1.dtype).itemsize
    x_itemsize = jnp.dtype(x.dtype).itemsize
    out_acc_in_place = jnp.dtype(x.dtype) == jnp.float32

    vmem_cap, vmem_budget = _vmem_budget()
    if vmem_limit_bytes is None:
        vmem_limit_bytes = vmem_budget

    E_pad = _round_up(E, 128)
    tm_auto, th_auto, H_pad = _select_tiles(
        n_tok, E_pad, H, w_itemsize, x_itemsize,
        vmem_cap, vmem_limit_bytes, out_acc_in_place)

    if tm is None:
        tm = tm_auto
    else:
        tm = max(8, _round_up(min(tm, _round_up(n_tok, 8)), 8))
    if th is None:
        th = th_auto
    else:
        H_base = _round_up(max(H, 128), 128)
        th = max(128, _round_up(min(th, H_base), 128))
        H_pad = _cdiv(H_base, th) * th

    n_pad = _cdiv(n_tok, tm) * tm
    n_rows = n_pad // tm
    n_h = H_pad // th
    resident = n_h == 1

    # Padding is a no-op when shapes are already lane-aligned.
    # TODO(synk): for repeated calls, pre-pad the weights once at parameter
    # setup instead of per call.
    x2 = _pad2(x.reshape(n_tok, E), n_pad, E_pad)
    w1p = _pad2(w1, E_pad, H_pad)
    w2p = _pad2(w2, H_pad, E_pad)
    b1p = _pad1(b1, H_pad).reshape(1, H_pad)
    b2p = _pad1(b2, E_pad).reshape(1, E_pad)

    # Advisory cost for XLA's scheduler around the custom call.
    w_bytes = (w1p.size + w2p.size + b1p.size + b2p.size) * w_itemsize
    cost = pl.CostEstimate(
        flops=4 * n_pad * E_pad * H_pad,
        transcendentals=n_pad * H_pad,
        bytes_accessed=(2 * n_pad * E_pad) * x_itemsize
        + w_bytes * (1 if resident else n_rows),
    )

    if resident:
        grid = (n_rows,)
        in_specs = [
            pl.BlockSpec((tm, E_pad), lambda i: (i, 0)),     # x row tile
            pl.BlockSpec((E_pad, th), lambda i: (0, 0)),     # full W1 (resident)
            pl.BlockSpec((1, th), lambda i: (0, 0)),         # b1
            pl.BlockSpec((th, E_pad), lambda i: (0, 0)),     # full W2 (resident)
            pl.BlockSpec((1, E_pad), lambda i: (0, 0)),      # b2
        ]
        out_specs = pl.BlockSpec((tm, E_pad), lambda i: (i, 0))
        kernel = ffn_kernel_resident
        scratch = []
        dims = ("parallel",)
    else:
        grid = (n_rows, n_h)
        in_specs = [
            pl.BlockSpec((tm, E_pad), lambda i, j: (i, 0)),  # x row tile (reused over j)
            pl.BlockSpec((E_pad, th), lambda i, j: (0, j)),  # W1 hidden tile
            pl.BlockSpec((1, th), lambda i, j: (0, j)),      # b1 hidden tile
            pl.BlockSpec((th, E_pad), lambda i, j: (j, 0)),  # W2 hidden tile
            pl.BlockSpec((1, E_pad), lambda i, j: (0, 0)),   # b2 (constant)
        ]
        out_specs = pl.BlockSpec((tm, E_pad), lambda i, j: (i, 0))
        if out_acc_in_place:
            kernel = ffn_kernel_tiled_f32out   # accumulate into resident output
            scratch = []
        else:
            kernel = ffn_kernel_tiled_acc
            scratch = [pltpu.VMEM((tm, E_pad), jnp.float32)]
        dims = ("parallel", "arbitrary")

    out2 = pl.pallas_call(
        kernel,
        out_shape=jax.ShapeDtypeStruct((n_pad, E_pad), x.dtype),
        grid_spec=pltpu.PrefetchScalarGridSpec(
            num_scalar_prefetch=0,
            grid=grid,
            in_specs=in_specs,
            out_specs=out_specs,
            scratch_shapes=scratch,
        ),
        compiler_params=pltpu.CompilerParams(
            dimension_semantics=dims,
            vmem_limit_bytes=vmem_limit_bytes,
        ),
        cost_estimate=cost,
    )(x2, w1p, b1p, w2p, b2p)

    return out2[:n_tok, :E].reshape(B, S, E)


def feed_forward_ref(x, w1, b1, w2, b2):
    x, w1, b1, w2, b2 = (a.astype(jnp.float32) for a in (x, w1, b1, w2, b2))
    h = jnp.einsum("bse,eh->bsh", x, w1) + b1
    g = 0.5 * h * (1.0 + jnp.tanh(jnp.float32(_GELU_C) * (h + 0.044715 * h ** 3)))
    return jnp.einsum("bsh,he->bse", g, w2) + b2


if __name__ == "__main__":
    key = jax.random.PRNGKey(0)
    kx, kw1, kb1, kw2, kb2 = jax.random.split(key, 5)

    # cfg = {"emb_dim": 32}
    B, S, E = 2, 8, 32
    H = 4 * E
    x = jax.random.normal(kx, (B, S, E), dtype=jnp.float32)
    w1 = jax.random.normal(kw1, (E, H), dtype=jnp.float32) * 0.05
    b1 = jax.random.normal(kb1, (H,), dtype=jnp.float32) * 0.01
    w2 = jax.random.normal(kw2, (H, E), dtype=jnp.float32) * 0.05
    b2 = jax.random.normal(kb2, (E,), dtype=jnp.float32) * 0.01

    # 1) Default path (weights fully resident, 1-D grid).
    out = jax.block_until_ready(feed_forward(x, w1, b1, w2, b2))
    ref = feed_forward_ref(x, w1, b1, w2, b2)
    assert out.shape == (B, S, E)
    assert jnp.allclose(out, ref, atol=1e-4, rtol=1e-4), "resident mismatch"

    # 2) Ragged token count (pad/mask path).
    x3 = jax.random.normal(kx, (1, 5, E), dtype=jnp.float32)
    out3 = jax.block_until_ready(feed_forward(x3, w1, b1, w2, b2))
    ref3 = feed_forward_ref(x3, w1, b1, w2, b2)
    assert out3.shape == (1, 5, E)
    assert jnp.allclose(out3, ref3, atol=1e-4, rtol=1e-4), "ragged mismatch"

    # 3) Forced hidden-dim tiling (f32 accumulate-into-output kernel).
    E2, H2 = 64, 256
    kx2, kw1b, kb1b, kw2b, kb2b = jax.random.split(jax.random.PRNGKey(1), 5)
    xb = jax.random.normal(kx2, (B, S, E2), dtype=jnp.float32)
    w1b = jax.random.normal(kw1b, (E2, H2), dtype=jnp.float32) * 0.05
    b1b = jax.random.normal(kb1b, (H2,), dtype=jnp.float32) * 0.01
    w2b = jax.random.normal(kw2b, (H2, E2), dtype=jnp.float32) * 0.05
    b2b = jax.random.normal(kb2b, (E2,), dtype=jnp.float32) * 0.01
    out4 = jax.block_until_ready(feed_forward(xb, w1b, b1b, w2b, b2b, th=128))
    ref4 = feed_forward_ref(xb, w1b, b1b, w2b, b2b)
    assert jnp.allclose(out4, ref4, atol=1e-4, rtol=1e-4), "tiled f32 mismatch"

    # 4) Forced tiling with bf16 activations/weights (f32-scratch kernel).
    xb16 = xb.astype(jnp.bfloat16)
    w1b16, b1b16 = w1b.astype(jnp.bfloat16), b1b.astype(jnp.bfloat16)
    w2b16, b2b16 = w2b.astype(jnp.bfloat16), b2b.astype(jnp.bfloat16)
    out5 = jax.block_until_ready(
        feed_forward(xb16, w1b16, b1b16, w2b16, b2b16, th=128))
    ref5 = feed_forward_ref(xb16, w1b16, b1b16, w2b16, b2b16)
    assert out5.dtype == jnp.bfloat16
    assert jnp.allclose(out5.astype(jnp.float32), ref5, atol=3e-2, rtol=3e-2), \
        "tiled bf16 mismatch"

    print("KERNEL_OK")
</pallas_src>

<mosaic_0001>
module attributes {stable_mosaic.version = 11 : i64} {
  func.func @ffn_kernel_resident(%arg0: i32, %arg1: memref<16x128xf32, #tpu.memory_space<vmem>>, %arg2: memref<128x128xf32, #tpu.memory_space<vmem>>, %arg3: memref<1x128xf32, #tpu.memory_space<vmem>>, %arg4: memref<128x128xf32, #tpu.memory_space<vmem>>, %arg5: memref<1x128xf32, #tpu.memory_space<vmem>>, %arg6: memref<16x128xf32, #tpu.memory_space<vmem>>) attributes {dimension_semantics = [#tpu.dimension_semantics<parallel>], iteration_bounds = array<i64: 1>, scalar_prefetch = 0 : i64, scratch_operands = 0 : i64, tpu.core_type = #tpu.core_type<tc>, window_params = [{transform_indices = @transform_0, window_bounds = array<i64: 16, 128>}, {pipeline_mode = #tpu.pipeline_mode<synchronous>, transform_indices = @transform_1, window_bounds = array<i64: 128, 128>}, {pipeline_mode = #tpu.pipeline_mode<synchronous>, transform_indices = @transform_2, window_bounds = array<i64: 1, 128>}, {pipeline_mode = #tpu.pipeline_mode<synchronous>, transform_indices = @transform_3, window_bounds = array<i64: 128, 128>}, {pipeline_mode = #tpu.pipeline_mode<synchronous>, transform_indices = @transform_4, window_bounds = array<i64: 1, 128>}, {transform_indices = @transform_5, window_bounds = array<i64: 16, 128>}]} {
    %c0 = arith.constant 0 : index
    %c0_0 = arith.constant 0 : index
    %0 = vector.load %arg1[%c0, %c0_0] : memref<16x128xf32, #tpu.memory_space<vmem>>, vector<16x128xf32>
    %c0_1 = arith.constant 0 : index
    %c0_2 = arith.constant 0 : index
    %1 = vector.load %arg2[%c0_1, %c0_2] : memref<128x128xf32, #tpu.memory_space<vmem>>, vector<128x128xf32>
    %cst = arith.constant dense<0.000000e+00> : vector<16x128xf32>
    %2 = tpu.matmul %0, %1, %cst {dimension_numbers = #tpu.dot_dimension_numbers<[1], [0], [0], [1], [0, 0, 1, 1], [], []>} : vector<16x128xf32>, vector<128x128xf32>, vector<16x128xf32> -> vector<16x128xf32>
    %c0_3 = arith.constant 0 : index
    %c0_4 = arith.constant 0 : index
    %3 = vector.load %arg3[%c0_3, %c0_4] : memref<1x128xf32, #tpu.memory_space<vmem>>, vector<1x128xf32>
    %4 = vector.broadcast %3 : vector<1x128xf32> to vector<16x128xf32>
    %5 = arith.addf %2, %4 : vector<16x128xf32>
    %cst_5 = arith.constant 5.000000e-01 : f32
    %6 = vector.broadcast %cst_5 : f32 to vector<16x128xf32>
    %7 = arith.mulf %6, %5 : vector<16x128xf32>
    %8 = arith.mulf %5, %5 : vector<16x128xf32>
    %9 = arith.mulf %8, %5 : vector<16x128xf32>
    %cst_6 = arith.constant 4.471500e-02 : f32
    %10 = vector.broadcast %cst_6 : f32 to vector<16x128xf32>
    %11 = arith.mulf %10, %9 : vector<16x128xf32>
    %12 = arith.addf %5, %11 : vector<16x128xf32>
    %cst_7 = arith.constant 0.797884583 : f32
    %13 = vector.broadcast %cst_7 : f32 to vector<16x128xf32>
    %14 = arith.mulf %13, %12 : vector<16x128xf32>
    %15 = math.tanh %14 : vector<16x128xf32>
    %cst_8 = arith.constant 1.000000e+00 : f32
    %16 = vector.broadcast %cst_8 : f32 to vector<16x128xf32>
    %17 = arith.addf %16, %15 : vector<16x128xf32>
    %18 = arith.mulf %7, %17 : vector<16x128xf32>
    %c0_9 = arith.constant 0 : index
    %c0_10 = arith.constant 0 : index
    %19 = vector.load %arg4[%c0_9, %c0_10] : memref<128x128xf32, #tpu.memory_space<vmem>>, vector<128x128xf32>
    %cst_11 = arith.constant dense<0.000000e+00> : vector<16x128xf32>
    %20 = tpu.matmul %18, %19, %cst_11 {dimension_numbers = #tpu.dot_dimension_numbers<[1], [0], [0], [1], [0, 0, 1, 1], [], []>} : vector<16x128xf32>, vector<128x128xf32>, vector<16x128xf32> -> vector<16x128xf32>
    %c0_12 = arith.constant 0 : index
    %c0_13 = arith.constant 0 : index
    %21 = vector.load %arg5[%c0_12, %c0_13] : memref<1x128xf32, #tpu.memory_space<vmem>>, vector<1x128xf32>
    %22 = vector.broadcast %21 : vector<1x128xf32> to vector<16x128xf32>
    %23 = arith.addf %20, %22 : vector<16x128xf32>
    %c0_14 = arith.constant 0 : index
    %c0_15 = arith.constant 0 : index
    %24 = vector.load %arg6[%c0_14, %c0_15] : memref<16x128xf32, #tpu.memory_space<vmem>>, vector<16x128xf32>
    tpu.vector_store %arg6[%c0_14, %c0_15], %23 {strides = array<i32>} : memref<16x128xf32, #tpu.memory_space<vmem>>, vector<16x128xf32>,
    return
  }
  func.func @transform_0(%arg0: i32) -> (i32, i32) {
    %c0_i32 = arith.constant 0 : i32
    %c0_i32_0 = arith.constant 0 : i32
    return %arg0, %c0_i32 : i32, i32
  }
  func.func @transform_1(%arg0: i32) -> (i32, i32) {
    %c0_i32 = arith.constant 0 : i32
    %c0_i32_0 = arith.constant 0 : i32
    %c0_i32_1 = arith.constant 0 : i32
    return %c0_i32, %c0_i32_0 : i32, i32
  }
  func.func @transform_2(%arg0: i32) -> (i32, i32) {
    %c0_i32 = arith.constant 0 : i32
    %c0_i32_0 = arith.constant 0 : i32
    %c0_i32_1 = arith.constant 0 : i32
    return %c0_i32, %c0_i32_0 : i32, i32
  }
  func.func @transform_3(%arg0: i32) -> (i32, i32) {
    %c0_i32 = arith.constant 0 : i32
    %c0_i32_0 = arith.constant 0 : i32
    %c0_i32_1 = arith.constant 0 : i32
    return %c0_i32, %c0_i32_0 : i32, i32
  }
  func.func @transform_4(%arg0: i32) -> (i32, i32) {
    %c0_i32 = arith.constant 0 : i32
    %c0_i32_0 = arith.constant 0 : i32
    %c0_i32_1 = arith.constant 0 : i32
    return %c0_i32, %c0_i32_0 : i32, i32
  }
  func.func @transform_5(%arg0: i32) -> (i32, i32) {
    %c0_i32 = arith.constant 0 : i32
    %c0_i32_0 = arith.constant 0 : i32
    return %arg0, %c0_i32 : i32, i32
  }
}

</mosaic_0001>

<bundles_post_ra>
// kernel: tpu_custom_call.1
= control target key start
LH: loop header
LB: loop body
LE: loop exit
PB: predicated region body
PF: predicated region fallthrough
CT: control target
= control target key end

     0   :  { %10 = vsyncpa [#allocation3], 0  ;;  %s775_s0 = inlined_call_operand.hbm [shape: f32[16,128], index: 0, kind: input, shape index: {}]   ;;  %s776_s1 = inlined_call_operand.hbm [shape: f32[128,128], index: 1, kind: input, shape index: {}]   ;;  %s777_s2 = inlined_call_operand.hbm [shape: f32[1,128], index: 2, kind: input, shape index: {}]   ;;  %s778_s3 = inlined_call_operand.hbm [shape: f32[128,128], index: 3, kind: input, shape index: {}]   ;;  %s779_s4 = inlined_call_operand.hbm [shape: f32[1,128], index: 4, kind: input, shape index: {}]   ;;  %s780_s5 = inlined_call_operand.hbm [shape: f32[16,128], index: 5, kind: output, shape index: {}]  }
   0x1   :  { %11 = vsyncpa [#allocation6], 0 }
   0x2   :  { %12 = vsyncpa [#allocation9], 0 }
   0x3   :  { %13 = vsyncpa [#allocation4], 0  ;;  %s646_s18 = smov [#allocation5]   ;;  %s647_s20 = smov [#allocation8]  }
   0x4   :  { %s31_s19 = sshll.u32 %s646_s18, 4  ;;  %s53_s21 = sshll.u32 %s647_s20, 4  ;;  %s32_s19 = int_to_ptr.vmem [resolvable:$true] %s31_s19  ;;  %s684_s21 = int_to_ptr.vmem [resolvable:$true] %s53_s21 }
   0x5   :  { %s506_s24 = scalar_lea.hbm %s776_s1, 2048 }
   0x6   :  { %p507_p0 = scmp.ne.s32.totalorder %s776_s1, %s506_s24  ;;  %p510_p1 = scmp.lt.u32.totalorder %s506_s24, %s776_s1 }
   0x8   :  { %p512_p2 = pnand %p510_p1, %p507_p0 }
   0xa   :  { %515 = shalt.err (!%p512_p2)
}
   0xb   :  { %s516_s29 = scalar_lea.vmem %s32_s19, 2048  ;;  %p521_p4 = scmp.lt.s32.totalorder %s32_s19, %s32_s19 }
   0xc   :  { %p517_p3 = scmp.ne.s32.totalorder %s32_s19, %s516_s29  ;;  %p522_p5 = scmp.lt.s32.totalorder %s516_s29, %s516_s29 }
   0xe   :  { %p523_p6 = por %p522_p5, %p521_p4 }
  0x10   :  { %p524_p7 = pnand %p523_p6, %p517_p3 }
  0x12   :  { %527 = shalt.err (!%p524_p7)
}
  0x13   :  { %s648_s30 = smov 128   ;;  %s649_s6 = smov 8  }
  0x14   :  { %37 = dma.hbm_to_vmem [thread:$0]  %s776_s1, 2048, %s32_s19, [#allocation6], %s648_s30, %s648_s30, %s649_s6  }
  0x15   :  { %s528_s11 = scalar_lea.hbm %s778_s3, 2048 }
  0x16   :  { %p529_p8 = scmp.ne.s32.totalorder %s778_s3, %s528_s11  ;;  %p532_p9 = scmp.lt.u32.totalorder %s528_s11, %s778_s3 }
  0x18   :  { %p534_p10 = pnand %p532_p9, %p529_p8 }
  0x1a   :  { %537 = shalt.err (!%p534_p10)
}
  0x1b   :  { %s538_s16 = scalar_lea.vmem %s684_s21, 2048  ;;  %p543_p12 = scmp.lt.s32.totalorder %s684_s21, %s684_s21 }
  0x1c   :  { %p539_p11 = scmp.ne.s32.totalorder %s684_s21, %s538_s16  ;;  %p544_p13 = scmp.lt.s32.totalorder %s538_s16, %s538_s16 }
  0x1e   :  { %p545_p0 = por %p544_p13, %p543_p12 }
  0x20   :  { %p546_p1 = pnand %p545_p0, %p539_p11 }
  0x22   :  { %549 = shalt.err (!%p546_p1)
}
  0x23   :  { %59 = dma.hbm_to_vmem [thread:$0]  %s778_s3, 2048, %s684_s21, [#allocation9], %s648_s30, %s648_s30, %s649_s6  }
  0x24   :  { %s650_s18 = smov [#allocation2]   ;;  %s651_s20 = smov [#allocation7]  }
  0x25   :  { %s19_s19 = sshll.u32 %s650_s18, 4  ;;  %s44_s22 = sshll.u32 %s651_s20, 4  ;;  %s20_s19 = int_to_ptr.vmem [resolvable:$true] %s19_s19  ;;  %s45_s22 = int_to_ptr.vmem [resolvable:$true] %s44_s22 }
  0x26   :  { %s550_s25 = scalar_lea.hbm %s775_s0, 256 }
  0x27   :  { %p551_p2 = scmp.ne.s32.totalorder %s775_s0, %s550_s25  ;;  %p554_p3 = scmp.lt.u32.totalorder %s550_s25, %s775_s0 }
  0x29   :  { %p556_p4 = pnand %p554_p3, %p551_p2 }
  0x2b   :  { %559 = shalt.err (!%p556_p4)
}
  0x2c   :  { %s560_s3 = scalar_lea.vmem %s20_s19, 256  ;;  %p565_p6 = scmp.lt.s32.totalorder %s20_s19, %s20_s19 }
  0x2d   :  { %p561_p5 = scmp.ne.s32.totalorder %s20_s19, %s560_s3  ;;  %p566_p7 = scmp.lt.s32.totalorder %s560_s3, %s560_s3 }
  0x2f   :  { %p567_p8 = por %p566_p7, %p565_p6 }
  0x31   :  { %p568_p9 = pnand %p567_p8, %p561_p5 }
  0x33   :  { %571 = shalt.err (!%p568_p9)
}
  0x34   :  { %25 = dma.hbm_to_vmem [thread:$0]  %s775_s0, 256, %s20_s19, [#allocation3], %s648_s30, %s648_s30, %s649_s6  }
  0x35   :  { %s572_s10 = scalar_lea.hbm %s777_s2, 16 }
  0x36   :  { %p573_p10 = scmp.ne.s32.totalorder %s777_s2, %s572_s10  ;;  %p576_p11 = scmp.lt.u32.totalorder %s572_s10, %s777_s2 }
  0x38   :  { %p578_p12 = pnand %p576_p11, %p573_p10 }
  0x3a   :  { %581 = shalt.err (!%p578_p12)
}
  0x3b   :  { %s582_s15 = scalar_lea.vmem %s45_s22, 16  ;;  %s586_s16 = scalar_lea.vmem %s45_s22, 32 }
  0x3c   :  { %p583_p13 = scmp.ne.s32.totalorder %s45_s22, %s582_s15  ;;  %p587_p0 = scmp.lt.s32.totalorder %s45_s22, %s45_s22 }
  0x3d   :  { %p588_p1 = scmp.lt.s32.totalorder %s586_s16, %s582_s15 }
  0x3f   :  { %p589_p2 = por %p588_p1, %p587_p0 }
  0x41   :  { %p590_p3 = pnand %p589_p2, %p583_p13 }
  0x43   :  { %593 = shalt.err (!%p590_p3)
}
  0x44   :  { %47 = dma.hbm_to_vmem [thread:$0]  %s777_s2, 16, %s45_s22, [#allocation6]  }
  0x45   :  { %s652_s17 = smov [#allocation10]   ;;  %s594_s23 = scalar_lea.hbm %s779_s4, 16 }
  0x46   :  { %s66_s18 = sshll.u32 %s652_s17, 4  ;;  %p595_p4 = scmp.ne.s32.totalorder %s779_s4, %s594_s23  ;;  %s67_s18 = int_to_ptr.vmem [resolvable:$true] %s66_s18 }
  0x47   :  { %p598_p5 = scmp.lt.u32.totalorder %s594_s23, %s779_s4 }
  0x49   :  { %p600_p6 = pnand %p598_p5, %p595_p4 }
  0x4b   :  { %603 = shalt.err (!%p600_p6)
}
  0x4c   :  { %s604_s28 = scalar_lea.vmem %s67_s18, 16  ;;  %s608_s2 = scalar_lea.vmem %s67_s18, 32 }
  0x4d   :  { %p605_p7 = scmp.ne.s32.totalorder %s67_s18, %s604_s28  ;;  %p609_p8 = scmp.lt.s32.totalorder %s67_s18, %s67_s18 }
  0x4e   :  { %p610_p9 = scmp.lt.s32.totalorder %s608_s2, %s604_s28 }
  0x50   :  { %p611_p10 = por %p610_p9, %p609_p8 }
  0x52   :  { %p612_p11 = pnand %p611_p10, %p605_p7 }
  0x54   :  { %615 = shalt.err (!%p612_p11)
}
  0x55   :  { %69 = dma.hbm_to_vmem [thread:$0]  %s779_s4, 16, %s67_s18, [#allocation9]  }
  0x56   :  { %638 = dma.done.wait [#allocation3], 256  }
  0x57   :  { %639 = vsyncadd [#allocation3], 4294967040 }
  0x58   :  { %640 = dma.done.wait [#allocation6], 2064  }
  0x59   :  { %641 = vsyncadd [#allocation6], 4294965232 }
  0x5a   :  { %642 = dma.done.wait [#allocation9], 2064  }
  0x5b   :  { %643 = vsyncadd [#allocation9], 4294965232  ;;  %v87_v0 = vld [vmem:[#allocation5] sm:$0xff]  ;;  %v88_v1 = vld [vmem:[#allocation5 + $0x8] sm:$0xff]  ;;  %s653_s4 = smov [#allocation11]  }
  0x5c   :  { %v89_v2 = vld [vmem:[#allocation5 + $0x10] sm:$0xff]  ;;  %v430_v3 = vpack.c.bf16 %v88_v1, %v87_v0  ;;  %v90_v4 = vld [vmem:[#allocation5 + $0x18] sm:$0xff]  ;;  %v91_v6 = vld [vmem:[#allocation5 + $0x20] sm:$0xff]  ;;  %s308_s3 = sshll.u32 %s653_s4, 4  ;;  %s309_s3 = int_to_ptr.vmem [resolvable:$true] %s308_s3 }
  0x5d   :  { %v434_v5 = vpack.c.bf16 %v90_v4, %v89_v2  ;;  %v92_v7 = vld [vmem:[#allocation5 + $0x28] sm:$0xff]  ;;  %v93_v9 = vld [vmem:[#allocation5 + $0x30] sm:$0xff]  ;;  %v94_v11 = vld [vmem:[#allocation5 + $0x38] sm:$0xff]  ;;  %s616_s21 = scalar_lea.vmem %s309_s3, 256  ;;  %p621_p13 = scmp.lt.s32.totalorder %s309_s3, %s309_s3 }
  0x5e   :  { %431 = vmatprep.subr.bf16.mxu0 %v430_v3  ;;  %v438_v8 = vpack.c.bf16 %v92_v7, %v91_v6  ;;  %v85_v10 = vld [vmem:[#allocation2] sm:$0xff]  ;;  %v203_v12 = vld [vmem:[#allocation8] sm:$0xff]  ;;  %v442_v15 = vpack.c.bf16 %v94_v11, %v93_v9  ;;  %v98_v20 = vld [vmem:[#allocation5 + $0x58] sm:$0xff]  ;;  %p617_p12 = scmp.ne.s32.totalorder %s309_s3, %s616_s21  ;;  %p622_p0 = scmp.lt.s32.totalorder %s616_s21, %s616_s21 }
  0x5f   :  { %433 = vmatpush3.bf16.msra.mxu0 %v430_v3  ;;  %392 = vmatprep.mubr.f32.mxu0 %v85_v10  ;;  %v204_v13 = vld [vmem:[#allocation8 + $0x8] sm:$0xff]  ;;  %v95_v16 = vld [vmem:[#allocation5 + $0x40] sm:$0xff]  ;;  %v102_v26 = vld [vmem:[#allocation5 + $0x78] sm:$0xff] }
  0x60   :  { %435 = vmatprep.subr.bf16.mxu0 %v434_v5  ;;  %v462_v14 = vpack.c.bf16 %v204_v13, %v203_v12  ;;  %v96_v17 = vld [vmem:[#allocation5 + $0x48] sm:$0xff]  ;;  %v97_v19 = vld [vmem:[#allocation5 + $0x50] sm:$0xff]  ;;  %v99_v22 = vld [vmem:[#allocation5 + $0x60] sm:$0xff]  ;;  %p623_p1 = por %p622_p0, %p621_p13 }
  0x61   :  { %v446_v18 = vpack.c.bf16 %v96_v17, %v95_v16  ;;  %v450_v21 = vpack.c.bf16 %v98_v20, %v97_v19  ;;  %v100_v23 = vld [vmem:[#allocation5 + $0x68] sm:$0xff]  ;;  %v101_v25 = vld [vmem:[#allocation5 + $0x70] sm:$0xff]  ;;  %v86_v28 = vld [vmem:[#allocation2 + $0x8] sm:$0xff] }
  0x62   :  { %463 = vmatprep.subr.bf16.mxu1 %v462_v14  ;;  %v454_v24 = vpack.c.bf16 %v100_v23, %v99_v22  ;;  %v458_v27 = vpack.c.bf16 %v102_v26, %v101_v25  ;;  %v205_v29 = vld [vmem:[#allocation8 + $0x10] sm:$0xff]  ;;  %v206_v30 = vld [vmem:[#allocation8 + $0x18] sm:$0xff]  ;;  %v207_v32 = vld [vmem:[#allocation8 + $0x20] sm:$0xff]  ;;  %p624_p2 = pnand %p623_p1, %p617_p12 }
  0x63   :  { %437 = vmatpush3.bf16.msra.mxu0 %v434_v5  ;;  %465 = vmatpush3.bf16.msra.mxu1 %v462_v14  ;;  %v466_v31 = vpack.c.bf16 %v206_v30, %v205_v29  ;;  %v208_v33 = vld [vmem:[#allocation8 + $0x28] sm:$0xff]  ;;  %v209_v35 = vld [vmem:[#allocation8 + $0x30] sm:$0xff]  ;;  %v210_v36 = vld [vmem:[#allocation8 + $0x38] sm:$0xff] }
  0x64   :  { %439 = vmatprep.subr.bf16.mxu0 %v438_v8  ;;  %v470_v34 = vpack.c.bf16 %v208_v33, %v207_v32  ;;  %v474_v37 = vpack.c.bf16 %v210_v36, %v209_v35  ;;  %v211_v38 = vld [vmem:[#allocation8 + $0x40] sm:$0xff]  ;;  %v212_v39 = vld [vmem:[#allocation8 + $0x48] sm:$0xff]  ;;  %v213_v40 = vld [vmem:[#allocation8 + $0x50] sm:$0xff] }
  0x65   :  { %467 = vmatprep.subr.bf16.mxu1 %v466_v31  ;;  %v478_v41 = vpack.c.bf16 %v212_v39, %v211_v38  ;;  %v214_v42 = vld [vmem:[#allocation8 + $0x58] sm:$0xff]  ;;  %v215_v44 = vld [vmem:[#allocation8 + $0x60] sm:$0xff]  ;;  %v216_v45 = vld [vmem:[#allocation8 + $0x68] sm:$0xff] }
  0x66   :  { %v482_v43 = vpack.c.bf16 %v214_v42, %v213_v40  ;;  %v486_v46 = vpack.c.bf16 %v216_v45, %v215_v44  ;;  %v217_v47 = vld [vmem:[#allocation8 + $0x70] sm:$0xff]  ;;  %v218_v48 = vld [vmem:[#allocation8 + $0x78] sm:$0xff]  ;;  %v323_v9 = vld [vmem:[#allocation10] ss:$0 sm:$0xff] }
  0x67   :  { %441 = vmatpush3.bf16.msra.mxu0 %v438_v8  ;;  %469 = vmatpush3.bf16.msra.mxu1 %v466_v31  ;;  %v490_v49 = vpack.c.bf16 %v218_v48, %v217_v47  ;;  %v322_v50 = vld [vmem:[#allocation7] ss:$0 sm:$0xff] }
  0x68   :  { %443 = vmatprep.subr.bf16.mxu0 %v442_v15  ;;  %471 = vmatprep.subr.bf16.mxu1 %v470_v34 }
  0x6b   :  { %445 = vmatpush3.bf16.msra.mxu0 %v442_v15  ;;  %473 = vmatpush3.bf16.msra.mxu1 %v470_v34 }
  0x6c   :  { %447 = vmatprep.subr.bf16.mxu0 %v446_v18  ;;  %475 = vmatprep.subr.bf16.mxu1 %v474_v37 }
  0x6f   :  { %449 = vmatpush3.bf16.msra.mxu0 %v446_v18  ;;  %477 = vmatpush3.bf16.msra.mxu1 %v474_v37 }
  0x70   :  { %451 = vmatprep.subr.bf16.mxu0 %v450_v21  ;;  %479 = vmatprep.subr.bf16.mxu1 %v478_v41 }
  0x73   :  { %453 = vmatpush3.bf16.msra.mxu0 %v450_v21  ;;  %481 = vmatpush3.bf16.msra.mxu1 %v478_v41 }
  0x74   :  { %455 = vmatprep.subr.bf16.mxu0 %v454_v24  ;;  %483 = vmatprep.subr.bf16.mxu1 %v482_v43 }
  0x77   :  { %457 = vmatpush3.bf16.msra.mxu0 %v454_v24  ;;  %485 = vmatpush3.bf16.msra.mxu1 %v482_v43 }
  0x78   :  { %459 = vmatprep.subr.bf16.mxu0 %v458_v27  ;;  %487 = vmatprep.subr.bf16.mxu1 %v486_v46 }
  0x7b   :  { %461 = vmatpush3.bf16.msra.mxu0 %v458_v27  ;;  %489 = vmatpush3.bf16.msra.mxu1 %v486_v46 }
  0x7c   :  { %491 = vmatprep.subr.bf16.mxu1 %v490_v49 }
  0x7e   :  { %393 = vmatmul.mubr.f32.vlgmr.msra.gmra.mrb[0].mxu0 %v86_v28 }
  0x7f   :  { %493 = vmatpush3.bf16.msra.mxu1 %v490_v49 }
 0x151   :  { %v394_v51 = vpop.f32.mrb[0].mxu0 }
 0x152   :  { %v182_v52 = vadd.f32 %v394_v51, %v322_v50  ;;  %v176_v53 = vpop.f32.mrb[1].mxu0 }
 0x153   :  { %v177_v54 = vadd.f32 %v322_v50, %v176_v53 }
 0x154   :  { %v188_v55 = vmul.f32 %v182_v52, %v182_v52  ;;  %v186_v6 = vmul.f32 0.5, %v182_v52 }
 0x155   :  { %v187_v56 = vmul.f32 %v177_v54, %v177_v54  ;;  %v185_v4 = vmul.f32 0.5, %v177_v54 }
 0x156   :  { %v190_v57 = vmul.f32 %v188_v55, %v182_v52 }
 0x157   :  { %v189_v58 = vmul.f32 %v187_v56, %v177_v54 }
 0x158   :  { %v192_v59 = vmul.f32 0.044715, %v190_v57 }
 0x159   :  { %v191_v60 = vmul.f32 0.044715, %v189_v58 }
 0x15a   :  { %v194_v61 = vadd.f32 %v192_v59, %v182_v52 }
 0x15b   :  { %v193_v62 = vadd.f32 %v191_v60, %v177_v54 }
 0x15c   :  { %v196_v63 = vmul.f32 0.7978846, %v194_v61 }
 0x15d   :  { %v195_v0 = vmul.f32 0.7978846, %v193_v62 }
 0x15e   :  { %502 = vtanh.f32 %v196_v63 }
 0x15f   :  { %504 = vtanh.f32 %v195_v0 }
 0x168   :  { %v503_v1 = vpop.eup %502 }
 0x169   :  { %v505_v2 = vpop.eup %504  ;;  %v200_v3 = vadd.f32 1.0, %v503_v1 }
 0x16a   :  { %v199_v5 = vadd.f32 1.0, %v505_v2 }
 0x16b   :  { %v202_v8 = vmul.f32 %v200_v3, %v186_v6 }
 0x16c   :  { %v201_v7 = vmul.f32 %v199_v5, %v185_v4 }
 0x16e   :  { %427 = vmatprep.mubr.f32.mxu1 %v201_v7 }
 0x16f   :  { %428 = vmatmul.mubr.f32.vlgmr.msra.gmra.mrb[0].mxu1 %v202_v8 }
 0x242   :  { %v429_v10 = vpop.f32.mrb[0].mxu1 }
 0x243   :  { %v298_v11 = vadd.f32 %v429_v10, %v323_v9  ;;  %v292_v12 = vpop.f32.mrb[1].mxu1 }
 0x244   :  { %v293_v13 = vadd.f32 %v323_v9, %v292_v12 }
 0x245   :  { %302 = vst [vmem:[#allocation11 + $0x8] sm:$0xff] %v298_v11 }
 0x246   :  { %301 = vst [vmem:[#allocation11] sm:$0xff] %v293_v13 }
 0x247   :  { %627 = shalt.err (!%p624_p2)
}
 0x248   :  { %s628_s9 = scalar_lea.hbm %s780_s5, 256 }
 0x249   :  { %p629_p3 = scmp.ne.s32.totalorder %s780_s5, %s628_s9  ;;  %p632_p4 = scmp.lt.u32.totalorder %s628_s9, %s780_s5 }
 0x24b   :  { %p634_p5 = pnand %p632_p4, %p629_p3 }
 0x24d   :  { %637 = shalt.err (!%p634_p5)
}
 0x24e   :  { %314 = dma.vmem_to_hbm [thread:$0]  %s309_s3, 256, %s780_s5, [#allocation4], %s648_s30, %s648_s30, %s649_s6  }
 0x24f   :  { %644 = dma.done.wait [#allocation4], 256  }
 0x250   :  { %645 = vsyncadd [#allocation4], 4294967040 }
 0x251   :  { %318 = vsyncpa [#allocation3], 1 }
 0x252   :  { %319 = vsyncpa [#allocation6], 1 }
 0x253   :  { %320 = vsyncpa [#allocation9], 1 }
 0x254   :  { %321 = vsyncpa [#allocation4], 1 }

</bundles_post_ra>
